<compile_context>
chip_gen: v6e
topology: v6e:2x2x1
jax: 0.10.0
libtpu: 0.0.40
codegen_flags: <defaults>
</compile_context>

<pallas_src>
import functools
import math

import jax
import jax.numpy as jnp
from jax import lax
from jax.experimental import pallas as pl
from jax.experimental.pallas import tpu as pltpu


def _round_up(x, m):
    return ((x + m - 1) // m) * m


def _sublane_multiple(dtype):
    # Minimum second-to-last block dim for the packed dtype
    # (8 rows per vreg for 32-bit, 16 for 16-bit, 32 for 8-bit).
    return max(8, 32 // jnp.dtype(dtype).itemsize)


def _perceptron_kernel(x_ref, w1t_ref, b1_ref, w2t_ref, b2_ref, o_ref, *,
                       approximate):
    # x_ref:   (TM, C)   row tile, caller dtype
    # w1t_ref: (C, 4C)   pre-transposed expansion weights (compute dtype)
    # b1_ref:  (1, 4C)   f32
    # w2t_ref: (4C, C)   pre-transposed projection weights (compute dtype)
    # b2_ref:  (1, C)    f32
    # In-kernel cast to the compute dtype (weights' dtype): free VPU work
    # instead of a separate wrapper-side HBM pass over x.
    x = x_ref[...].astype(w1t_ref.dtype)

    # Expansion matmul: standard (M,K)x(K,N) contraction -> MXU, f32 accum.
    h = jnp.dot(x, w1t_ref[...], preferred_element_type=jnp.float32)
    h = h + b1_ref[...]                                        # (TM, 4C), f32

    if approximate:
        # tanh-approx GELU: tanh lands on the otherwise-idle EUP slot,
        # relieving the VPU (useful on v6e/v7x).  ~1e-3 deviation from the
        # torch.nn.GELU() exact default.
        c = math.sqrt(2.0 / math.pi)
        g = 0.5 * h * (1.0 + jnp.tanh(c * (h + 0.044715 * h * h * h)))
    else:
        # Exact erf GELU -- matches torch.nn.GELU() default semantics.
        g = 0.5 * h * (1.0 + lax.erf(h * (1.0 / math.sqrt(2.0))))

    g = g.astype(w2t_ref.dtype)                                # compute dtype

    # Projection matmul.
    y = jnp.dot(g, w2t_ref[...], preferred_element_type=jnp.float32)
    y = y + b2_ref[...]                                        # (TM, C), f32

    o_ref[...] = y.astype(o_ref.dtype)


def perceptron_forward(x_bwc, w1_dc, b1_d, w2_cd, b2_c, *, tm=2048,
                       compute_dtype=None, approximate=False):
    """Fused MLP forward matching `Perceptron.forward`.

    x_bwc : (B, W, C)
    w1_dc : (4C, C)   nn.Linear weight layout (out, in)
    b1_d  : (4C,)
    w2_cd : (C, 4C)   nn.Linear weight layout (out, in)
    b2_c  : (C,)
    tm    : row tile; 1024-4096 recommended (multiple of 256).
    compute_dtype : optional matmul-input dtype (e.g. jnp.bfloat16).  GELU,
            accumulation and the output stay f32 / the input dtype.
    approximate   : tanh-approximate GELU (EUP offload); default exact erf.
    """
    B, W, C = x_bwc.shape
    D = 4 * C
    assert w1_dc.shape == (D, C) and b1_d.shape == (D,)
    assert w2_cd.shape == (C, D) and b2_c.shape == (C,)
    M = B * W

    cdt = x_bwc.dtype if compute_dtype is None else compute_dtype

    # x stays in its original dtype: reshape of a contiguous array is free,
    # and the compute-dtype cast happens inside the kernel.
    x2d = x_bwc.reshape(M, C)

    # One-time ~16 KiB transposes of the PyTorch (out, in) weights so the
    # kernel contraction is (M,K)x(K,N) with no per-step in-kernel relayout.
    w1t = w1_dc.T.astype(cdt)                       # (C, D)
    w2t = w2_cd.T.astype(cdt)                       # (D, C)
    b1 = b1_d.reshape(1, D).astype(jnp.float32)
    b2 = b2_c.reshape(1, C).astype(jnp.float32)

    # Row tile: large to amortize per-grid-step overhead; clamp to the row
    # count rounded up to the dtype's minimum sublane tile for small inputs.
    sub = _sublane_multiple(x_bwc.dtype)
    tm_eff = min(tm, _round_up(M, sub))
    grid = (pl.cdiv(M, tm_eff),)

    # NOTE: w1t/b1/w2t/b2 are grid-invariant (constant index_map) -> fetched
    # once, VMEM resident (< 200 KiB total at C=32).  VMEM at tm=2048:
    # ~0.5 MiB double-buffered x/out tiles + ~1 MiB f32 intermediates --
    # far below even v7x's 32 MiB scoped default, so no explicit
    # vmem_limit_bytes / pl.Buffered(1) needed at this size.
    out2d = pl.pallas_call(
        functools.partial(_perceptron_kernel, approximate=approximate),
        out_shape=jax.ShapeDtypeStruct((M, C), x_bwc.dtype),
        grid_spec=pltpu.PrefetchScalarGridSpec(
            num_scalar_prefetch=0,
            grid=grid,
            in_specs=[
                pl.BlockSpec((tm_eff, C), lambda i: (i, 0)),   # x row tile
                pl.BlockSpec((C, D), lambda i: (0, 0)),        # w1.T (resident)
                pl.BlockSpec((1, D), lambda i: (0, 0)),        # b1
                pl.BlockSpec((D, C), lambda i: (0, 0)),        # w2.T (resident)
                pl.BlockSpec((1, C), lambda i: (0, 0)),        # b2
            ],
            out_specs=pl.BlockSpec((tm_eff, C), lambda i: (i, 0)),
        ),
        compiler_params=pltpu.CompilerParams(
            dimension_semantics=("parallel",),
        ),
    )(x2d, w1t, b1, w2t, b2)

    return out2d.reshape(B, W, C)


def _reference(x_bwc, w1_dc, b1_d, w2_cd, b2_c, approximate=False):
    h = jnp.einsum("bwc,dc->bwd", x_bwc, w1_dc) + b1_d
    if approximate:
        c = math.sqrt(2.0 / math.pi)
        g = 0.5 * h * (1.0 + jnp.tanh(c * (h + 0.044715 * h ** 3)))
    else:
        g = 0.5 * h * (1.0 + lax.erf(h / math.sqrt(2.0)))
    return jnp.einsum("bwd,cd->bwc", g, w2_cd) + b2_c


if __name__ == "__main__":
    # PerceptronParameters: coordinates=32, bias=True
    C = 32
    D = 4 * C

    key = jax.random.PRNGKey(0)
    kx, kw1, kb1, kw2, kb2, kx2 = jax.random.split(key, 6)

    # Deterministic init mimicking nn.Linear's uniform(-1/sqrt(fan_in), ...)
    lim1 = 1.0 / math.sqrt(C)
    w1 = jax.random.uniform(kw1, (D, C), minval=-lim1, maxval=lim1, dtype=jnp.float32)
    b1 = jax.random.uniform(kb1, (D,), minval=-lim1, maxval=lim1, dtype=jnp.float32)
    lim2 = 1.0 / math.sqrt(D)
    w2 = jax.random.uniform(kw2, (C, D), minval=-lim2, maxval=lim2, dtype=jnp.float32)
    b2 = jax.random.uniform(kb2, (C,), minval=-lim2, maxval=lim2, dtype=jnp.float32)

    # Case 1: small spec shape (B, W, C) = (2, 8, 32), f32, strict tolerance.
    x_small = jax.random.normal(kx, (2, 8, C), dtype=jnp.float32)
    out_small = jax.block_until_ready(perceptron_forward(x_small, w1, b1, w2, b2))
    ref_small = _reference(x_small, w1, b1, w2, b2)
    assert out_small.shape == x_small.shape
    assert jnp.allclose(out_small, ref_small, atol=1e-5, rtol=1e-5), \
        "f32 small-shape mismatch vs JAX reference"

    # Case 2: M = 5600 rows -> multiple tm=2048 grid steps + ragged last block.
    x_big = jax.random.normal(kx2, (8, 700, C), dtype=jnp.float32)
    out_big = jax.block_until_ready(perceptron_forward(x_big, w1, b1, w2, b2))
    ref_big = _reference(x_big, w1, b1, w2, b2)
    assert out_big.shape == x_big.shape
    assert jnp.allclose(out_big, ref_big, atol=1e-4, rtol=1e-4), \
        "f32 tiled/ragged-edge mismatch vs JAX reference"

    # Case 3: bf16 MXU compute path (x cast inside the kernel), relaxed tol.
    out_bf16 = jax.block_until_ready(
        perceptron_forward(x_big, w1, b1, w2, b2, compute_dtype=jnp.bfloat16))
    assert jnp.allclose(out_bf16, ref_big, atol=5e-2, rtol=5e-2), \
        "bf16 compute path mismatch vs JAX reference"

    # Case 4: tanh-approximate GELU (EUP offload) vs the matching reference.
    out_tanh = jax.block_until_ready(
        perceptron_forward(x_big, w1, b1, w2, b2, approximate=True))
    ref_tanh = _reference(x_big, w1, b1, w2, b2, approximate=True)
    assert jnp.allclose(out_tanh, ref_tanh, atol=1e-4, rtol=1e-4), \
        "tanh-GELU path mismatch vs JAX reference"

    print("KERNEL_OK")
</pallas_src>

<mosaic_0001>
module attributes {stable_mosaic.version = 11 : i64} {
  func.func @_perceptron_kernel(%arg0: i32, %arg1: memref<16x32xf32, #tpu.memory_space<vmem>>, %arg2: memref<32x128xf32, #tpu.memory_space<vmem>>, %arg3: memref<1x128xf32, #tpu.memory_space<vmem>>, %arg4: memref<128x32xf32, #tpu.memory_space<vmem>>, %arg5: memref<1x32xf32, #tpu.memory_space<vmem>>, %arg6: memref<16x32xf32, #tpu.memory_space<vmem>>) attributes {dimension_semantics = [#tpu.dimension_semantics<parallel>], iteration_bounds = array<i64: 1>, scalar_prefetch = 0 : i64, scratch_operands = 0 : i64, tpu.core_type = #tpu.core_type<tc>, window_params = [{transform_indices = @transform_0, window_bounds = array<i64: 16, 32>}, {pipeline_mode = #tpu.pipeline_mode<synchronous>, transform_indices = @transform_1, window_bounds = array<i64: 32, 128>}, {pipeline_mode = #tpu.pipeline_mode<synchronous>, transform_indices = @transform_2, window_bounds = array<i64: 1, 128>}, {pipeline_mode = #tpu.pipeline_mode<synchronous>, transform_indices = @transform_3, window_bounds = array<i64: 128, 32>}, {pipeline_mode = #tpu.pipeline_mode<synchronous>, transform_indices = @transform_4, window_bounds = array<i64: 1, 32>}, {transform_indices = @transform_5, window_bounds = array<i64: 16, 32>}]} {
    %c0 = arith.constant 0 : index
    %c0_0 = arith.constant 0 : index
    %0 = vector.load %arg1[%c0, %c0_0] : memref<16x32xf32, #tpu.memory_space<vmem>>, vector<16x32xf32>
    %c0_1 = arith.constant 0 : index
    %c0_2 = arith.constant 0 : index
    %1 = vector.load %arg2[%c0_1, %c0_2] : memref<32x128xf32, #tpu.memory_space<vmem>>, vector<32x128xf32>
    %cst = arith.constant dense<0.000000e+00> : vector<16x128xf32>
    %2 = tpu.matmul %0, %1, %cst {dimension_numbers = #tpu.dot_dimension_numbers<[1], [0], [0], [1], [0, 0, 1, 1], [], []>} : vector<16x32xf32>, vector<32x128xf32>, vector<16x128xf32> -> vector<16x128xf32>
    %c0_3 = arith.constant 0 : index
    %c0_4 = arith.constant 0 : index
    %3 = vector.load %arg3[%c0_3, %c0_4] : memref<1x128xf32, #tpu.memory_space<vmem>>, vector<1x128xf32>
    %4 = vector.broadcast %3 : vector<1x128xf32> to vector<16x128xf32>
    %5 = arith.addf %2, %4 : vector<16x128xf32>
    %cst_5 = arith.constant 5.000000e-01 : f32
    %6 = vector.broadcast %cst_5 : f32 to vector<16x128xf32>
    %7 = arith.mulf %6, %5 : vector<16x128xf32>
    %cst_6 = arith.constant 0.707106769 : f32
    %8 = vector.broadcast %cst_6 : f32 to vector<16x128xf32>
    %9 = arith.mulf %5, %8 : vector<16x128xf32>
    %10 = math.erf %9 : vector<16x128xf32>
    %cst_7 = arith.constant 1.000000e+00 : f32
    %11 = vector.broadcast %cst_7 : f32 to vector<16x128xf32>
    %12 = arith.addf %11, %10 : vector<16x128xf32>
    %13 = arith.mulf %7, %12 : vector<16x128xf32>
    %c0_8 = arith.constant 0 : index
    %c0_9 = arith.constant 0 : index
    %14 = vector.load %arg4[%c0_8, %c0_9] : memref<128x32xf32, #tpu.memory_space<vmem>>, vector<128x32xf32>
    %cst_10 = arith.constant dense<0.000000e+00> : vector<16x32xf32>
    %15 = tpu.matmul %13, %14, %cst_10 {dimension_numbers = #tpu.dot_dimension_numbers<[1], [0], [0], [1], [0, 0, 1, 1], [], []>} : vector<16x128xf32>, vector<128x32xf32>, vector<16x32xf32> -> vector<16x32xf32>
    %c0_11 = arith.constant 0 : index
    %c0_12 = arith.constant 0 : index
    %16 = vector.load %arg5[%c0_11, %c0_12] : memref<1x32xf32, #tpu.memory_space<vmem>>, vector<1x32xf32>
    %17 = vector.broadcast %16 : vector<1x32xf32> to vector<16x32xf32>
    %18 = arith.addf %15, %17 : vector<16x32xf32>
    %c0_13 = arith.constant 0 : index
    %c0_14 = arith.constant 0 : index
    %19 = vector.load %arg6[%c0_13, %c0_14] : memref<16x32xf32, #tpu.memory_space<vmem>>, vector<16x32xf32>
    tpu.vector_store %arg6[%c0_13, %c0_14], %18 {strides = array<i32>} : memref<16x32xf32, #tpu.memory_space<vmem>>, vector<16x32xf32>,
    return
  }
  func.func @transform_0(%arg0: i32) -> (i32, i32) {
    %c0_i32 = arith.constant 0 : i32
    %c0_i32_0 = arith.constant 0 : i32
    return %arg0, %c0_i32 : i32, i32
  }
  func.func @transform_1(%arg0: i32) -> (i32, i32) {
    %c0_i32 = arith.constant 0 : i32
    %c0_i32_0 = arith.constant 0 : i32
    %c0_i32_1 = arith.constant 0 : i32
    return %c0_i32, %c0_i32_0 : i32, i32
  }
  func.func @transform_2(%arg0: i32) -> (i32, i32) {
    %c0_i32 = arith.constant 0 : i32
    %c0_i32_0 = arith.constant 0 : i32
    %c0_i32_1 = arith.constant 0 : i32
    return %c0_i32, %c0_i32_0 : i32, i32
  }
  func.func @transform_3(%arg0: i32) -> (i32, i32) {
    %c0_i32 = arith.constant 0 : i32
    %c0_i32_0 = arith.constant 0 : i32
    %c0_i32_1 = arith.constant 0 : i32
    return %c0_i32, %c0_i32_0 : i32, i32
  }
  func.func @transform_4(%arg0: i32) -> (i32, i32) {
    %c0_i32 = arith.constant 0 : i32
    %c0_i32_0 = arith.constant 0 : i32
    %c0_i32_1 = arith.constant 0 : i32
    return %c0_i32, %c0_i32_0 : i32, i32
  }
  func.func @transform_5(%arg0: i32) -> (i32, i32) {
    %c0_i32 = arith.constant 0 : i32
    %c0_i32_0 = arith.constant 0 : i32
    return %arg0, %c0_i32 : i32, i32
  }
}

</mosaic_0001>

<bundles_post_ra>
// kernel: tpu_custom_call.1
= control target key start
LH: loop header
LB: loop body
LE: loop exit
PB: predicated region body
PF: predicated region fallthrough
CT: control target
= control target key end

     0   :  { %vm34_vm0 = vcmask 261120   ;;  %s457_s0 = inlined_call_operand.vmem [shape: f32[16,32], index: 0, kind: input, shape index: {}]   ;;  %s458_s1 = inlined_call_operand.vmem [shape: f32[32,128], index: 1, kind: input, shape index: {}]   ;;  %s459_s2 = inlined_call_operand.vmem [shape: f32[1,128], index: 2, kind: input, shape index: {}]   ;;  %s460_s3 = inlined_call_operand.vmem [shape: f32[128,32], index: 3, kind: input, shape index: {}]   ;;  %s461_s4 = inlined_call_operand.vmem [shape: f32[1,32], index: 4, kind: input, shape index: {}]   ;;  %s462_s5 = inlined_call_operand.hbm [shape: f32[16,32], index: 5, kind: output, shape index: {}]  }
   0x1   :  { %v26_v0 = vld [vmem:[%s458_s1 + $0x18] sm:$0xff]  ;;  %v25_v1 = vld [vmem:[%s458_s1 + $0x10] sm:$0xff]  ;;  %v21_v2 = vld [vmem:[%s457_s0] sm:$0xff] }
   0x2   :  { %270 = vmatprep.subr.mxu0 %v26_v0  ;;  %v24_v3 = vld [vmem:[%s458_s1 + $0x8] sm:$0xff]  ;;  %278 = vmatprep.mubr.msk.f32.mxu0 %vm34_vm0, %v21_v2  ;;  %v141_v4 = vld [vmem:[%s460_s3 + $0x78] sm:$0xff]  ;;  %v140_v5 = vld [vmem:[%s460_s3 + $0x70] sm:$0xff] }
   0x3   :  { %271 = vmatpush3.msra.mxu0 %v26_v0  ;;  %281 = vmatprep.subr.mxu1 %v141_v4 }
   0x4   :  { %272 = vmatprep.subr.mxu0 %v25_v1 }
   0x5   :  { %10 = vsyncpa [#allocation3], 0  ;;  %273 = vmatpush3.msra.mxu0 %v25_v1  ;;  %v23_v6 = vld [vmem:[%s458_s1] sm:$0xff]  ;;  %282 = vmatpush3.msra.mxu1 %v141_v4  ;;  %v139_v7 = vld [vmem:[%s460_s3 + $0x68] sm:$0xff]  ;;  %s345_s11 = smov [#allocation2]  }
   0x6   :  { %274 = vmatprep.subr.mxu0 %v24_v3  ;;  %283 = vmatprep.subr.mxu1 %v140_v5  ;;  %v22_v8 = vld [vmem:[%s457_s0 + $0x8] sm:$0xff]  ;;  %v138_v9 = vld [vmem:[%s460_s3 + $0x60] sm:$0xff]  ;;  %v137_v10 = vld [vmem:[%s460_s3 + $0x58] sm:$0xff]  ;;  %s231_s12 = sshll.u32 %s345_s11, 4  ;;  %s232_s12 = int_to_ptr.vmem [resolvable:$true] %s231_s12 }
   0x7   :  { %275 = vmatpush3.msra.mxu0 %v24_v3  ;;  %284 = vmatpush3.msra.mxu1 %v140_v5  ;;  %v136_v11 = vld [vmem:[%s460_s3 + $0x50] sm:$0xff]  ;;  %v135_v12 = vld [vmem:[%s460_s3 + $0x48] sm:$0xff]  ;;  %v134_v13 = vld [vmem:[%s460_s3 + $0x40] sm:$0xff]  ;;  %s323_s13 = scalar_lea.vmem %s232_s12, 256  ;;  %p328_p1 = scmp.lt.s32.totalorder %s232_s12, %s232_s12 }
   0x8   :  { %276 = vmatprep.subr.mxu0 %v23_v6  ;;  %285 = vmatprep.subr.mxu1 %v139_v7  ;;  %v133_v14 = vld [vmem:[%s460_s3 + $0x38] sm:$0xff]  ;;  %v132_v15 = vld [vmem:[%s460_s3 + $0x30] sm:$0xff]  ;;  %v131_v16 = vld [vmem:[%s460_s3 + $0x28] sm:$0xff]  ;;  %p324_p0 = scmp.ne.s32.totalorder %s232_s12, %s323_s13  ;;  %p329_p2 = scmp.lt.s32.totalorder %s323_s13, %s323_s13 }
   0x9   :  { %277 = vmatpush3.msra.mxu0 %v23_v6  ;;  %286 = vmatpush3.msra.mxu1 %v139_v7  ;;  %v130_v17 = vld [vmem:[%s460_s3 + $0x20] sm:$0xff]  ;;  %v129_v18 = vld [vmem:[%s460_s3 + $0x18] sm:$0xff]  ;;  %v128_v19 = vld [vmem:[%s460_s3 + $0x10] sm:$0xff] }
   0xa   :  { %279 = vmatmul.mubr.msk.f32.vlgmr.msra.gmra.mxu0 %vm34_vm0, %v22_v8  ;;  %287 = vmatprep.subr.mxu1 %v138_v9  ;;  %v127_v20 = vld [vmem:[%s460_s3 + $0x8] sm:$0xff]  ;;  %v126_v21 = vld [vmem:[%s460_s3] sm:$0xff]  ;;  %p330_p3 = por %p329_p2, %p328_p1 }
   0xb   :  { %288 = vmatpush3.msra.mxu1 %v138_v9  ;;  %v242_v22 = vld [vmem:[%s459_s2] ss:$0 sm:$0xff] }
   0xc   :  { %289 = vmatprep.subr.mxu1 %v137_v10  ;;  %v245_v37 = vld [vmem:[%s461_s4] ss:$0 sm:$0xff]  ;;  %p331_p4 = pnand %p330_p3, %p324_p0 }
   0xd   :  { %290 = vmatpush3.msra.mxu1 %v137_v10 }
   0xe   :  { %291 = vmatprep.subr.mxu1 %v136_v11 }
   0xf   :  { %292 = vmatpush3.msra.mxu1 %v136_v11 }
  0x10   :  { %293 = vmatprep.subr.mxu1 %v135_v12 }
  0x11   :  { %294 = vmatpush3.msra.mxu1 %v135_v12 }
  0x12   :  { %295 = vmatprep.subr.mxu1 %v134_v13 }
  0x13   :  { %296 = vmatpush3.msra.mxu1 %v134_v13 }
  0x14   :  { %297 = vmatprep.subr.mxu1 %v133_v14 }
  0x15   :  { %298 = vmatpush3.msra.mxu1 %v133_v14 }
  0x16   :  { %299 = vmatprep.subr.mxu1 %v132_v15 }
  0x17   :  { %300 = vmatpush3.msra.mxu1 %v132_v15 }
  0x18   :  { %301 = vmatprep.subr.mxu1 %v131_v16 }
  0x19   :  { %302 = vmatpush3.msra.mxu1 %v131_v16 }
  0x1a   :  { %303 = vmatprep.subr.mxu1 %v130_v17 }
  0x1b   :  { %304 = vmatpush3.msra.mxu1 %v130_v17 }
  0x1c   :  { %305 = vmatprep.subr.mxu1 %v129_v18 }
  0x1d   :  { %306 = vmatpush3.msra.mxu1 %v129_v18 }
  0x1e   :  { %307 = vmatprep.subr.mxu1 %v128_v19 }
  0x1f   :  { %308 = vmatpush3.msra.mxu1 %v128_v19 }
  0x20   :  { %309 = vmatprep.subr.mxu1 %v127_v20 }
  0x21   :  { %310 = vmatpush3.msra.mxu1 %v127_v20 }
  0x22   :  { %311 = vmatprep.subr.mxu1 %v126_v21 }
  0x23   :  { %312 = vmatpush3.msra.mxu1 %v126_v21 }
  0xca   :  { %v280_v23 = vpop.f32.mrf.mxu0 }
  0xcb   :  { %v113_v24 = vadd.f32 %v280_v23, %v242_v22 }
  0xcc   :  { %v107_v25 = vpop.f32.mrf.mxu0 }
  0xcd   :  { %v119_v26 = vmul.f32 0.70710677, %v113_v24  ;;  %v108_v27 = vadd.f32 %v242_v22, %v107_v25  ;;  %v117_v34 = vmul.f32 0.5, %v113_v24 }
  0xcf   :  { %319 = verf.f32 %v119_v26  ;;  %v118_v28 = vmul.f32 0.70710677, %v108_v27  ;;  %v116_v32 = vmul.f32 0.5, %v108_v27 }
  0xd1   :  { %321 = verf.f32 %v118_v28 }
  0xdc   :  { %v320_v29 = vpop.eup %319 }
  0xdd   :  { %v123_v31 = vadd.f32 1.0, %v320_v29 }
  0xde   :  { %v322_v30 = vpop.eup %321 }
  0xdf   :  { %v122_v33 = vadd.f32 1.0, %v322_v30  ;;  %v125_v36 = vmul.f32 %v123_v31, %v117_v34 }
  0xe1   :  { %v124_v35 = vmul.f32 %v122_v33, %v116_v32 }
  0xe3   :  { %313 = vmatprep.mubr.f32.mxu1 %v124_v35 }
  0xe4   :  { %314 = vmatmul.mubr.f32.vlgmr.msra.gmra.mxu1 %v125_v36 }
 0x1a4   :  { %v315_v38 = vpop.f32.mrf.mxu1 }
 0x1a5   :  { %v221_v39 = vadd.f32 %v315_v38, %v245_v37 }
 0x1a6   :  { %v215_v40 = vpop.f32.mrf.mxu1 }
 0x1a7   :  { %225 = vst.msk [vmem:[#allocation2 + $0x8] sm:$0xff] %vm34_vm0, %v221_v39  ;;  %v216_v41 = vadd.f32 %v245_v37, %v215_v40 }
 0x1a9   :  { %224 = vst.msk [vmem:[#allocation2] sm:$0xff] %vm34_vm0, %v216_v41 }
 0x1aa   :  { %334 = shalt.err (!%p331_p4)
}
 0x1ab   :  { %s346_s0 = smov 128   ;;  %s347_s4 = smov 8  }
 0x1ac   :  { %237 = dma.vmem_to_hbm [thread:$0]  %s232_s12, 256, %s462_s5, [#allocation3], %s346_s0, %s346_s0, %s347_s4  }
 0x1ad   :  { %343 = dma.done.wait [#allocation3], 256  }
 0x1ae   :  { %344 = vsyncadd [#allocation3], 4294967040 }
 0x1af   :  { %241 = vsyncpa [#allocation3], 1 }

</bundles_post_ra>
